<compile_context>
chip_gen: v7x
topology: tpu7x:2x2x1
jax: 0.10.0
libtpu: 0.0.40
codegen_flags: <defaults>
</compile_context>

<pallas_src>
import functools

import jax
import jax.numpy as jnp
from jax.experimental import pallas as pl
from jax.experimental.pallas import tpu as pltpu

_LANE = 128      # vreg lane width
_SUBLANE = 8     # f32 sublane count


def _round_up(n: int, m: int) -> int:
    return ((n + m - 1) // m) * m


def qnetwork_kernel(x_ref, w1_ref, b1_ref, w2_ref, b2_ref, o_ref):
    # dense1: (TB, F_pad) @ (F_pad, H_pad) + (1, H_pad), then ReLU (VPU).
    h = jnp.dot(x_ref[...], w1_ref[...], preferred_element_type=jnp.float32)
    h = jnp.maximum(h + b1_ref[...], 0.0)
    # dense2: (TB, H_pad) @ (H_pad, A_pad) + (1, A_pad).
    out = jnp.dot(h, w2_ref[...], preferred_element_type=jnp.float32)
    o_ref[...] = out + b2_ref[...]


@functools.partial(jax.jit, static_argnames=("block_b",))
def qnetwork_forward(x, w1, b1, w2, b2, *, block_b: int = 256):
    """x: (B, in_features); w1: (in, hidden); b1: (1, hidden);
       w2: (hidden, action_dim); b2: (1, action_dim).  Returns (B, action_dim)."""
    B, F = x.shape
    H = w1.shape[1]
    A = w2.shape[1]

    # Lane-dense padding of all feature dims (zeros -> results unchanged).
    F_pad = _round_up(F, _LANE)
    H_pad = _round_up(H, _LANE)
    A_pad = _round_up(A, _LANE)

    # Batch tile: big enough to amortize the ~0.35 us/step grid overhead,
    # sublane-aligned, and small enough that the double-buffered x/o tiles
    # plus resident weights fit comfortably even in v7x's 64 MiB VMEM
    # (TB=256 x 128 lanes x 4 B = 128 KiB per tile).
    TB = block_b if B >= block_b else _round_up(B, _SUBLANE)
    B_pad = _round_up(B, TB)

    f32 = jnp.float32
    x_p = jnp.pad(x.astype(f32), ((0, B_pad - B), (0, F_pad - F)))
    w1_p = jnp.pad(w1.astype(f32), ((0, F_pad - F), (0, H_pad - H)))
    b1_p = jnp.pad(b1.astype(f32), ((0, 0), (0, H_pad - H)))
    w2_p = jnp.pad(w2.astype(f32), ((0, H_pad - H), (0, A_pad - A)))
    b2_p = jnp.pad(b2.astype(f32), ((0, 0), (0, A_pad - A)))

    grid = (B_pad // TB,)

    cost = pl.CostEstimate(
        flops=2 * B_pad * (F_pad * H_pad + H_pad * A_pad),
        transcendentals=0,
        bytes_accessed=4 * (B_pad * F_pad + F_pad * H_pad + H_pad
                            + H_pad * A_pad + A_pad + B_pad * A_pad),
    )

    out_p = pl.pallas_call(
        qnetwork_kernel,
        out_shape=jax.ShapeDtypeStruct((B_pad, A_pad), f32),
        grid_spec=pltpu.PrefetchScalarGridSpec(
            num_scalar_prefetch=0,
            grid=grid,
            in_specs=[
                # x: tiled along batch (double-buffered by the pipeline).
                pl.BlockSpec((TB, F_pad), lambda i: (i, 0)),
                # Weights / biases: same block every grid step -> stay
                # resident in VMEM, no re-DMA per batch tile.
                pl.BlockSpec((F_pad, H_pad), lambda i: (0, 0)),
                pl.BlockSpec((1, H_pad), lambda i: (0, 0)),
                pl.BlockSpec((H_pad, A_pad), lambda i: (0, 0)),
                pl.BlockSpec((1, A_pad), lambda i: (0, 0)),
            ],
            out_specs=pl.BlockSpec((TB, A_pad), lambda i: (i, 0)),
        ),
        compiler_params=pltpu.CompilerParams(
            dimension_semantics=("parallel",),  # shards across v7x's 2 TCs
        ),
        cost_estimate=cost,
    )(x_p, w1_p, b1_p, w2_p, b2_p)

    # Strip batch and lane padding (fused into the jitted wrapper).
    return out_p[:B, :A]


def init_params(key, in_features, hidden_features, action_dim):
    """Deterministic init mimicking torch.nn.Linear's U(-1/sqrt(fan_in), +1/sqrt(fan_in))."""
    k1, k2, k3, k4 = jax.random.split(key, 4)
    lim1 = 1.0 / jnp.sqrt(jnp.float32(in_features))
    lim2 = 1.0 / jnp.sqrt(jnp.float32(hidden_features))
    # Stored directly in (in, out) layout (already transposed vs. torch's (out, in)).
    w1 = jax.random.uniform(k1, (in_features, hidden_features), jnp.float32, -lim1, lim1)
    b1 = jax.random.uniform(k2, (1, hidden_features), jnp.float32, -lim1, lim1)
    w2 = jax.random.uniform(k3, (hidden_features, action_dim), jnp.float32, -lim2, lim2)
    b2 = jax.random.uniform(k4, (1, action_dim), jnp.float32, -lim2, lim2)
    return w1, b1, w2, b2


def _reference(x, w1, b1, w2, b2):
    return jnp.maximum(x @ w1 + b1, 0.0) @ w2 + b2


if __name__ == "__main__":
    # Small shapes implied by the forward: a batch of flat feature vectors.
    in_features = 16
    hidden_features = 32
    action_dim = 4

    key = jax.random.PRNGKey(0)
    kx, kp, kx2 = jax.random.split(key, 3)
    w1, b1, w2, b2 = init_params(kp, in_features, hidden_features, action_dim)

    # Case 1: tiny batch (single grid step, TB rounded to a sublane multiple).
    batch = 8
    x = jax.random.normal(kx, (batch, in_features), dtype=jnp.float32)
    out = jax.block_until_ready(qnetwork_forward(x, w1, b1, w2, b2))
    ref = _reference(x, w1, b1, w2, b2)
    assert out.shape == (batch, action_dim)
    assert jnp.allclose(out, ref, atol=1e-5, rtol=1e-5)

    # Case 2: larger, non-tile-multiple batch (exercises the grid + batch padding).
    batch2 = 300
    x2 = jax.random.normal(kx2, (batch2, in_features), dtype=jnp.float32)
    out2 = jax.block_until_ready(qnetwork_forward(x2, w1, b1, w2, b2))
    ref2 = _reference(x2, w1, b1, w2, b2)
    assert out2.shape == (batch2, action_dim)
    assert jnp.allclose(out2, ref2, atol=1e-5, rtol=1e-5)

    print("KERNEL_OK")
</pallas_src>

<mosaic_0001>
module attributes {stable_mosaic.version = 11 : i64} {
  func.func @qnetwork_kernel(%arg0: i32, %arg1: memref<8x128xf32, #tpu.memory_space<vmem>>, %arg2: memref<128x128xf32, #tpu.memory_space<vmem>>, %arg3: memref<1x128xf32, #tpu.memory_space<vmem>>, %arg4: memref<128x128xf32, #tpu.memory_space<vmem>>, %arg5: memref<1x128xf32, #tpu.memory_space<vmem>>, %arg6: memref<8x128xf32, #tpu.memory_space<vmem>>) attributes {dimension_semantics = [#tpu.dimension_semantics<parallel>], iteration_bounds = array<i64: 1>, scalar_prefetch = 0 : i64, scratch_operands = 0 : i64, tpu.core_type = #tpu.core_type<tc>, window_params = [{transform_indices = @transform_0, window_bounds = array<i64: 8, 128>}, {pipeline_mode = #tpu.pipeline_mode<synchronous>, transform_indices = @transform_1, window_bounds = array<i64: 128, 128>}, {pipeline_mode = #tpu.pipeline_mode<synchronous>, transform_indices = @transform_2, window_bounds = array<i64: 1, 128>}, {pipeline_mode = #tpu.pipeline_mode<synchronous>, transform_indices = @transform_3, window_bounds = array<i64: 128, 128>}, {pipeline_mode = #tpu.pipeline_mode<synchronous>, transform_indices = @transform_4, window_bounds = array<i64: 1, 128>}, {transform_indices = @transform_5, window_bounds = array<i64: 8, 128>}]} {
    %c0 = arith.constant 0 : index
    %c0_0 = arith.constant 0 : index
    %0 = vector.load %arg1[%c0, %c0_0] : memref<8x128xf32, #tpu.memory_space<vmem>>, vector<8x128xf32>
    %c0_1 = arith.constant 0 : index
    %c0_2 = arith.constant 0 : index
    %1 = vector.load %arg2[%c0_1, %c0_2] : memref<128x128xf32, #tpu.memory_space<vmem>>, vector<128x128xf32>
    %cst = arith.constant dense<0.000000e+00> : vector<8x128xf32>
    %2 = tpu.matmul %0, %1, %cst {dimension_numbers = #tpu.dot_dimension_numbers<[1], [0], [0], [1], [0, 0, 1, 1], [], []>} : vector<8x128xf32>, vector<128x128xf32>, vector<8x128xf32> -> vector<8x128xf32>
    %c0_3 = arith.constant 0 : index
    %c0_4 = arith.constant 0 : index
    %3 = vector.load %arg3[%c0_3, %c0_4] : memref<1x128xf32, #tpu.memory_space<vmem>>, vector<1x128xf32>
    %4 = vector.broadcast %3 : vector<1x128xf32> to vector<8x128xf32>
    %5 = arith.addf %2, %4 : vector<8x128xf32>
    %cst_5 = arith.constant 0.000000e+00 : f32
    %6 = vector.broadcast %cst_5 : f32 to vector<8x128xf32>
    %7 = arith.maximumf %5, %6 : vector<8x128xf32>
    %c0_6 = arith.constant 0 : index
    %c0_7 = arith.constant 0 : index
    %8 = vector.load %arg4[%c0_6, %c0_7] : memref<128x128xf32, #tpu.memory_space<vmem>>, vector<128x128xf32>
    %cst_8 = arith.constant dense<0.000000e+00> : vector<8x128xf32>
    %9 = tpu.matmul %7, %8, %cst_8 {dimension_numbers = #tpu.dot_dimension_numbers<[1], [0], [0], [1], [0, 0, 1, 1], [], []>} : vector<8x128xf32>, vector<128x128xf32>, vector<8x128xf32> -> vector<8x128xf32>
    %c0_9 = arith.constant 0 : index
    %c0_10 = arith.constant 0 : index
    %10 = vector.load %arg5[%c0_9, %c0_10] : memref<1x128xf32, #tpu.memory_space<vmem>>, vector<1x128xf32>
    %11 = vector.broadcast %10 : vector<1x128xf32> to vector<8x128xf32>
    %12 = arith.addf %9, %11 : vector<8x128xf32>
    %c0_11 = arith.constant 0 : index
    %c0_12 = arith.constant 0 : index
    %13 = vector.load %arg6[%c0_11, %c0_12] : memref<8x128xf32, #tpu.memory_space<vmem>>, vector<8x128xf32>
    tpu.vector_store %arg6[%c0_11, %c0_12], %12 {strides = array<i32>} : memref<8x128xf32, #tpu.memory_space<vmem>>, vector<8x128xf32>,
    return
  }
  func.func @transform_0(%arg0: i32) -> (i32, i32) {
    %c0_i32 = arith.constant 0 : i32
    %c0_i32_0 = arith.constant 0 : i32
    return %arg0, %c0_i32 : i32, i32
  }
  func.func @transform_1(%arg0: i32) -> (i32, i32) {
    %c0_i32 = arith.constant 0 : i32
    %c0_i32_0 = arith.constant 0 : i32
    %c0_i32_1 = arith.constant 0 : i32
    return %c0_i32, %c0_i32_0 : i32, i32
  }
  func.func @transform_2(%arg0: i32) -> (i32, i32) {
    %c0_i32 = arith.constant 0 : i32
    %c0_i32_0 = arith.constant 0 : i32
    %c0_i32_1 = arith.constant 0 : i32
    return %c0_i32, %c0_i32_0 : i32, i32
  }
  func.func @transform_3(%arg0: i32) -> (i32, i32) {
    %c0_i32 = arith.constant 0 : i32
    %c0_i32_0 = arith.constant 0 : i32
    %c0_i32_1 = arith.constant 0 : i32
    return %c0_i32, %c0_i32_0 : i32, i32
  }
  func.func @transform_4(%arg0: i32) -> (i32, i32) {
    %c0_i32 = arith.constant 0 : i32
    %c0_i32_0 = arith.constant 0 : i32
    %c0_i32_1 = arith.constant 0 : i32
    return %c0_i32, %c0_i32_0 : i32, i32
  }
  func.func @transform_5(%arg0: i32) -> (i32, i32) {
    %c0_i32 = arith.constant 0 : i32
    %c0_i32_0 = arith.constant 0 : i32
    return %arg0, %c0_i32 : i32, i32
  }
}

</mosaic_0001>

<bundles_post_ra>
// kernel: qnetwork_forward.1
= control target key start
LH: loop header
LB: loop body
LE: loop exit
PB: predicated region body
PF: predicated region fallthrough
CT: control target
= control target key end

     0   :  { %v370_v0 = vmov 0.0|0.0   ;;  %vm371_vm0 = vmmov 0   ;;  %v372_v4 = vmov 0.0   ;;  %s527_s1 = inlined_call_operand.vmem [shape: f32[128,128], index: 1, kind: input, shape index: {}]   ;;  %s528_s3 = inlined_call_operand.vmem [shape: f32[128,128], index: 3, kind: input, shape index: {}]   ;;  %s529_s0 = inlined_call_operand.vmem [shape: f32[8,128], index: 0, kind: input, shape index: {}]   ;;  %s530_s2 = inlined_call_operand.vmem [shape: f32[1,128], index: 2, kind: input, shape index: {}]   ;;  %s531_s4 = inlined_call_operand.vmem [shape: f32[1,128], index: 4, kind: input, shape index: {}]   ;;  %s532_s5 = inlined_call_operand.vmem [shape: f32[8,128], index: 5, kind: output, shape index: {}]  }
   0x1   :  { %319 = vmatprep.subr.bf16.mxu0 %v370_v0  ;;  %v21_v1 = vld [vmem:[%s527_s1] sm:$0xff]  ;;  %v22_v2 = vld [vmem:[%s527_s1 + $0x8] sm:$0xff]  ;;  %v23_v3 = vld [vmem:[%s527_s1 + $0x10] sm:$0xff]  ;;  %281 = vmatprep.mubr.msk.f32.mxu0 %vm371_vm0, %v372_v4 }
   0x2   :  { %v320_v5 = vpack.c.bf16 %v22_v2, %v21_v1  ;;  %v24_v6 = vld [vmem:[%s527_s1 + $0x18] sm:$0xff]  ;;  %343 = vmatprep.subr.bf16.mxu1 %v370_v0  ;;  %316 = vmatprep.mubr.msk.f32.mxu1 %vm371_vm0, %v372_v4  ;;  %v25_v8 = vld [vmem:[%s527_s1 + $0x20] sm:$0xff]  ;;  %v26_v9 = vld [vmem:[%s527_s1 + $0x28] sm:$0xff] }
   0x3   :  { %v323_v7 = vpack.c.bf16 %v24_v6, %v23_v3  ;;  %v115_v10 = vld [vmem:[%s528_s3] sm:$0xff]  ;;  %v116_v11 = vld [vmem:[%s528_s3 + $0x8] sm:$0xff]  ;;  %v117_v12 = vld [vmem:[%s528_s3 + $0x10] sm:$0xff]  ;;  %v326_v14 = vpack.c.bf16 %v26_v9, %v25_v8 }
   0x4   :  { %321 = vmatpush3.bf16.msra.mxu0 %v320_v5  ;;  %v118_v13 = vld [vmem:[%s528_s3 + $0x18] sm:$0xff]  ;;  %v344_v15 = vpack.c.bf16 %v116_v11, %v115_v10  ;;  %v27_v16 = vld [vmem:[%s527_s1 + $0x30] sm:$0xff]  ;;  %v119_v19 = vld [vmem:[%s528_s3 + $0x20] sm:$0xff] }
   0x5   :  { %322 = vmatprep.subr.bf16.mxu0 %v370_v0  ;;  %v28_v17 = vld [vmem:[%s527_s1 + $0x38] sm:$0xff]  ;;  %v347_v18 = vpack.c.bf16 %v118_v13, %v117_v12  ;;  %v120_v20 = vld [vmem:[%s528_s3 + $0x28] sm:$0xff]  ;;  %v29_v22 = vld [vmem:[%s527_s1 + $0x40] sm:$0xff] }
   0x6   :  { %345 = vmatpush3.bf16.msra.mxu1 %v344_v15  ;;  %v329_v21 = vpack.c.bf16 %v28_v17, %v27_v16  ;;  %v30_v23 = vld [vmem:[%s527_s1 + $0x48] sm:$0xff]  ;;  %v350_v24 = vpack.c.bf16 %v120_v20, %v119_v19  ;;  %v121_v25 = vld [vmem:[%s528_s3 + $0x30] sm:$0xff]  ;;  %v122_v26 = vld [vmem:[%s528_s3 + $0x38] sm:$0xff] }
   0x7   :  { %346 = vmatprep.subr.bf16.mxu1 %v370_v0  ;;  %v332_v27 = vpack.c.bf16 %v30_v23, %v29_v22  ;;  %v31_v28 = vld [vmem:[%s527_s1 + $0x50] sm:$0xff]  ;;  %v32_v29 = vld [vmem:[%s527_s1 + $0x58] sm:$0xff]  ;;  %v353_v30 = vpack.c.bf16 %v122_v26, %v121_v25  ;;  %v123_v31 = vld [vmem:[%s528_s3 + $0x40] sm:$0xff] }
   0x8   :  { %324 = vmatpush3.bf16.msra.mxu0 %v323_v7  ;;  %v124_v32 = vld [vmem:[%s528_s3 + $0x48] sm:$0xff]  ;;  %v335_v33 = vpack.c.bf16 %v32_v29, %v31_v28  ;;  %v33_v34 = vld [vmem:[%s527_s1 + $0x60] sm:$0xff]  ;;  %v125_v37 = vld [vmem:[%s528_s3 + $0x50] sm:$0xff] }
   0x9   :  { %325 = vmatprep.subr.bf16.mxu0 %v370_v0  ;;  %v34_v35 = vld [vmem:[%s527_s1 + $0x68] sm:$0xff]  ;;  %v356_v36 = vpack.c.bf16 %v124_v32, %v123_v31  ;;  %v126_v38 = vld [vmem:[%s528_s3 + $0x58] sm:$0xff]  ;;  %v35_v40 = vld [vmem:[%s527_s1 + $0x70] sm:$0xff] }
   0xa   :  { %348 = vmatpush3.bf16.msra.mxu1 %v347_v18  ;;  %v338_v39 = vpack.c.bf16 %v34_v35, %v33_v34  ;;  %v36_v41 = vld [vmem:[%s527_s1 + $0x78] sm:$0xff]  ;;  %v359_v42 = vpack.c.bf16 %v126_v38, %v125_v37  ;;  %v127_v43 = vld [vmem:[%s528_s3 + $0x60] sm:$0xff]  ;;  %v128_v44 = vld [vmem:[%s528_s3 + $0x68] sm:$0xff] }
   0xb   :  { %349 = vmatprep.subr.bf16.mxu1 %v370_v0  ;;  %v341_v45 = vpack.c.bf16 %v36_v41, %v35_v40  ;;  %v362_v46 = vpack.c.bf16 %v128_v44, %v127_v43  ;;  %v20_v47 = vld [vmem:[%s529_s0] sm:$0xff]  ;;  %v129_v48 = vld [vmem:[%s528_s3 + $0x70] sm:$0xff]  ;;  %v130_v49 = vld [vmem:[%s528_s3 + $0x78] sm:$0xff] }
   0xc   :  { %327 = vmatpush3.bf16.msra.mxu0 %v326_v14  ;;  %v365_v50 = vpack.c.bf16 %v130_v49, %v129_v48  ;;  %v213_v51 = vld [vmem:[%s530_s2] ss:$0 sm:$0xff] }
   0xd   :  { %328 = vmatprep.subr.bf16.mxu0 %v370_v0  ;;  %v214_v56 = vld [vmem:[%s531_s4] ss:$0 sm:$0xff] }
   0xe   :  { %351 = vmatpush3.bf16.msra.mxu1 %v350_v24 }
   0xf   :  { %352 = vmatprep.subr.bf16.mxu1 %v370_v0 }
  0x10   :  { %330 = vmatpush3.bf16.msra.mxu0 %v329_v21 }
  0x11   :  { %331 = vmatprep.subr.bf16.mxu0 %v370_v0 }
  0x12   :  { %354 = vmatpush3.bf16.msra.mxu1 %v353_v30 }
  0x13   :  { %355 = vmatprep.subr.bf16.mxu1 %v370_v0 }
  0x14   :  { %333 = vmatpush3.bf16.msra.mxu0 %v332_v27 }
  0x15   :  { %334 = vmatprep.subr.bf16.mxu0 %v370_v0 }
  0x16   :  { %357 = vmatpush3.bf16.msra.mxu1 %v356_v36 }
  0x17   :  { %358 = vmatprep.subr.bf16.mxu1 %v370_v0 }
  0x18   :  { %336 = vmatpush3.bf16.msra.mxu0 %v335_v33 }
  0x19   :  { %337 = vmatprep.subr.bf16.mxu0 %v370_v0 }
  0x1a   :  { %360 = vmatpush3.bf16.msra.mxu1 %v359_v42 }
  0x1b   :  { %361 = vmatprep.subr.bf16.mxu1 %v370_v0 }
  0x1c   :  { %339 = vmatpush3.bf16.msra.mxu0 %v338_v39 }
  0x1d   :  { %340 = vmatprep.subr.bf16.mxu0 %v370_v0 }
  0x1e   :  { %363 = vmatpush3.bf16.msra.mxu1 %v362_v46 }
  0x1f   :  { %364 = vmatprep.subr.bf16.mxu1 %v370_v0 }
  0x20   :  { %342 = vmatpush3.bf16.msra.mxu0 %v341_v45 }
  0x22   :  { %366 = vmatpush3.bf16.msra.mxu1 %v365_v50 }
  0x23   :  { %282 = vmatmul.mubr.f32.vlgmr.msra.gmra.mrb[0].mxu0 %v20_v47 }
  0xf6   :  { %v110_v52 = vpop.f32.mrb[0].mxu0 }
  0xf7   :  { %v111_v53 = vadd.f32 %v213_v51, %v110_v52  ;;  %v283_v54 = vpop.f32.mrb[1].mxu0 }
  0xf9   :  { %v114_v55 = vmax.f32 %v111_v53, 0.0 }
  0xfb   :  { %317 = vmatmul.mubr.f32.vlgmr.msra.gmra.mrb[0].mxu1 %v114_v55 }
 0x1ce   :  { %v204_v57 = vpop.f32.mrb[0].mxu1 }
 0x1cf   :  { %v205_v58 = vadd.f32 %v214_v56, %v204_v57  ;;  %v318_v59 = vpop.f32.mrb[1].mxu1 }
 0x1d1   :  { %208 = vst [vmem:[%s532_s5] sm:$0xff] %v205_v58 }

</bundles_post_ra>
